<compile_context>
chip_gen: v7x
topology: tpu7x:2x2x1
jax: 0.10.0
libtpu: 0.0.40
codegen_flags: <defaults>
</compile_context>

<pallas_src>
import functools

import jax
import jax.numpy as jnp
from jax.experimental import pallas as pl
from jax.experimental.pallas import tpu as pltpu


def _res_mlp_kernel(x_ref, w_ref, b_ref, g_ref, be_ref,
                    wo_ref, bo_ref, go_ref, beo_ref, alpha_ref,
                    o_ref, *, eps, n_blocks):
    """Fused (L-1) x [Linear->PReLU->LayerNorm] + out-layer, one row-tile per grid step."""

    def layer_norm(y, gamma, beta):
        # Two-pass mean/variance (matches PyTorch LayerNorm numerics); rsqrt rides the EUP.
        mean = jnp.mean(y, axis=-1, keepdims=True)
        d = y - mean
        var = jnp.mean(d * d, axis=-1, keepdims=True)
        return d * jax.lax.rsqrt(var + eps) * gamma + beta

    h = x_ref[...]                                     # (TR, H), compute dtype (bf16/f32)
    acc = None                                         # out-layer f32 accumulator

    for i in range(n_blocks):                          # static unroll over residual blocks
        # Linear: MXU matmul, native (bf16) operands, f32 accumulation.
        y = jnp.dot(h, w_ref[i], preferred_element_type=jnp.float32)
        y = y + b_ref[i].astype(jnp.float32)           # (1, H) bias broadcast
        # PReLU, scalar slope from SMEM.
        a = alpha_ref[i]
        y = jnp.where(y > 0.0, y, a * y)
        # Dropout is identity at inference time.
        hf = layer_norm(y, g_ref[i].astype(jnp.float32), be_ref[i].astype(jnp.float32))
        # Next-layer activation back in the MXU operand dtype.
        h = hf.astype(x_ref.dtype)
        # Out-layer partial matmul: this block's slice of concat(hist) times the matching
        # K-slice of the out weight.  The HBM/VMEM concat never exists.
        part = jnp.dot(h, wo_ref[i], preferred_element_type=jnp.float32)
        acc = part if acc is None else acc + part

    # Out-layer epilogue (f32).
    y = acc + bo_ref[...].astype(jnp.float32)
    a = alpha_ref[n_blocks]
    y = jnp.where(y > 0.0, y, a * y)
    out = layer_norm(y, go_ref[...].astype(jnp.float32), beo_ref[...].astype(jnp.float32))
    o_ref[...] = out.astype(o_ref.dtype)


def _round_up(x, m):
    return ((x + m - 1) // m) * m


def _physical_vmem_bytes():
    # Conservative fallback = v7x (64 MiB/TC) if the query is unavailable.
    try:
        return int(pltpu.get_tpu_info().vmem_capacity_bytes)
    except Exception:
        return 64 * 1024 * 1024


def _default_tile_rows(n, num_hidden, sublane):
    """Row-tile size: sublane-aligned, clamped by live f32 intermediates, >= 4 grid steps."""
    if n <= sublane:
        return sublane
    # ~4 MiB budget for the ~4 live (TR, H) f32 intermediates (h/y/hf/acc) per review.
    cap = (4 * 1024 * 1024) // (4 * 4 * max(num_hidden, 1))
    cap = max(sublane, (cap // sublane) * sublane)
    tr = max(sublane, (min(512, cap) // sublane) * sublane)
    # Shrink until we have >= 4 grid steps (v7x megacore + DMA/compute overlap) or hit floor.
    while tr > sublane and -(-n // tr) < 4:
        tr = max(sublane, (tr // 2 // sublane) * sublane)
    return tr


def res_mlp_encoder_forward(x_dict, params, *, tile_rows=None, eps=1e-5,
                            compute_dtype=jnp.bfloat16):
    """Pallas implementation of ResMLPEncoder.forward (inference), single pallas_call.

    `compute_dtype` is the MXU operand dtype (bf16 default for native MXU rate); all
    bias/PReLU/LayerNorm math stays in f32 and the output dtype matches the input.
    """
    x = x_dict["h"]                                    # (N, H)
    n, H = x.shape
    n_blocks = params["w"].shape[0]
    assert params["w"].shape == (n_blocks, H, H)
    assert params["w_out"].shape == (n_blocks, H, H)

    compute_dtype = jnp.dtype(compute_dtype)
    sublane = 16 if compute_dtype == jnp.dtype(jnp.bfloat16) else 8
    if tile_rows is None:
        tile_rows = _default_tile_rows(n, H, sublane)
    n_pad = pl.cdiv(n, tile_rows) * tile_rows

    # MXU operands in compute dtype; epilogue params stay f32.
    x_in = x.astype(compute_dtype)
    if n_pad != n:
        x_in = jnp.pad(x_in, ((0, n_pad - n), (0, 0)))
    w = params["w"].astype(compute_dtype)
    w_out = params["w_out"].astype(compute_dtype)

    # PReLU slopes for all blocks + out layer, as a 1-D f32 SMEM table.
    alphas = jnp.concatenate([
        jnp.asarray(params["alpha"], jnp.float32).reshape(-1),
        jnp.asarray(params["alpha_out"], jnp.float32).reshape(-1),
    ])

    kernel = functools.partial(_res_mlp_kernel, eps=eps, n_blocks=n_blocks)

    # ---- VMEM budget (sized, not hard-coded) -------------------------------------------
    c_item = compute_dtype.itemsize
    o_item = jnp.dtype(x.dtype).itemsize
    weight_bytes = 2 * n_blocks * H * H * c_item                 # w + w_out, Buffered(1)
    vec_bytes = (3 * n_blocks + 3) * H * 4 * 2                   # biases / LN params
    io_bytes = 2 * tile_rows * H * (c_item + o_item)             # x & out tiles, double-buffered
    live_bytes = 6 * tile_rows * H * 4                           # f32 intermediates + slack
    needed = weight_bytes + vec_bytes + io_bytes + live_bytes
    phys = _physical_vmem_bytes()
    vmem_limit = max(int(needed * 1.5), 16 * 1024 * 1024)
    vmem_limit = min(vmem_limit, int(phys * 0.8))
    vmem_limit = max(vmem_limit, min(needed, phys))              # never below the real need

    # ---- Cost estimate -------------------------------------------------------------------
    flops = 4 * n_pad * H * H * n_blocks                         # block matmuls + K-split out matmul
    bytes_accessed = (n_pad * H * c_item                         # x in
                      + 2 * n_blocks * H * H * c_item            # weights
                      + n_pad * H * o_item)                      # out
    cost = pl.CostEstimate(flops=int(flops),
                           transcendentals=int(n_pad * (n_blocks + 1)),
                           bytes_accessed=int(bytes_accessed))

    def _const_spec(shape):
        # Grid-invariant block: single-buffer it (no point double-buffering a constant tile).
        return pl.BlockSpec(shape, lambda i, _nd=len(shape): (0,) * _nd,
                            pipeline_mode=pl.Buffered(1))

    out = pl.pallas_call(
        kernel,
        out_shape=jax.ShapeDtypeStruct((n_pad, H), x.dtype),
        grid_spec=pltpu.PrefetchScalarGridSpec(
            num_scalar_prefetch=0,
            grid=(n_pad // tile_rows,),
            in_specs=[
                pl.BlockSpec((tile_rows, H), lambda i: (i, 0)),        # x row tile
                _const_spec((n_blocks, H, H)),                         # block weights (in,out)
                _const_spec((n_blocks, 1, H)),                         # block biases
                _const_spec((n_blocks, 1, H)),                         # LN gammas
                _const_spec((n_blocks, 1, H)),                         # LN betas
                _const_spec((n_blocks, H, H)),                         # out weight, K-split
                _const_spec((1, H)),                                   # out bias
                _const_spec((1, H)),                                   # out LN gamma
                _const_spec((1, H)),                                   # out LN beta
                pl.BlockSpec(memory_space=pltpu.MemorySpace.SMEM),     # PReLU alphas (scalars)
            ],
            out_specs=pl.BlockSpec((tile_rows, H), lambda i: (i, 0)),
        ),
        compiler_params=pltpu.CompilerParams(
            dimension_semantics=("parallel",),
            vmem_limit_bytes=int(vmem_limit)),
        cost_estimate=cost,
    )(x_in,
      w, params["b"], params["gamma"], params["beta"],
      w_out, params["b_out"], params["gamma_out"], params["beta_out"],
      alphas)

    return out[:n] if n_pad != n else out


def init_params(key, num_hidden, num_layers, weight_dtype=jnp.float32):
    """Deterministic synthetic parameters matching the module's __init__ shapes (stacked).

    w      : (L-1, H, H)  per-block Linear weight, pre-transposed (in, out)
    w_out  : (L-1, H, H)  out-layer weight, pre-transposed and split along its K dim:
                          w_out[i] == W_out.T[i*H:(i+1)*H, :]
    """
    n_blocks = num_layers - 1
    H = num_hidden
    ks = jax.random.split(key, 8)
    params = {
        "w": (0.1 * jax.random.normal(ks[0], (n_blocks, H, H), jnp.float32)).astype(weight_dtype),
        "b": 0.1 * jax.random.normal(ks[1], (n_blocks, 1, H), jnp.float32),
        "gamma": 1.0 + 0.05 * jax.random.normal(ks[2], (n_blocks, 1, H), jnp.float32),
        "beta": 0.05 * jax.random.normal(ks[3], (n_blocks, 1, H), jnp.float32),
        "alpha": jnp.full((n_blocks,), 0.25, jnp.float32),        # PReLU default init
        "w_out": (0.1 * jax.random.normal(ks[4], (n_blocks, H, H), jnp.float32)).astype(weight_dtype),
        "b_out": 0.1 * jax.random.normal(ks[5], (1, H), jnp.float32),
        "gamma_out": 1.0 + 0.05 * jax.random.normal(ks[6], (1, H), jnp.float32),
        "beta_out": 0.05 * jax.random.normal(ks[7], (1, H), jnp.float32),
        "alpha_out": jnp.float32(0.25),
    }
    return params


def _reference_forward(x_dict, params, eps=1e-5):
    """Pure-JAX f32 reference (explicit concat + full out matmul) for correctness check."""
    def block(x, w, b, alpha, gamma, beta):
        y = x @ w.astype(jnp.float32) + b
        y = jnp.where(y > 0, y, alpha * y)
        mean = jnp.mean(y, axis=-1, keepdims=True)
        var = jnp.mean((y - mean) ** 2, axis=-1, keepdims=True)
        return (y - mean) / jnp.sqrt(var + eps) * gamma + beta

    x = x_dict["h"].astype(jnp.float32)
    n_blocks, H, _ = params["w"].shape
    hist = []
    for i in range(n_blocks):
        x = block(x, params["w"][i], params["b"][i], params["alpha"][i],
                  params["gamma"][i], params["beta"][i])
        hist.append(x)
    x_cat = jnp.concatenate(hist, axis=1)                         # (N, H*(L-1))
    w_out_full = params["w_out"].astype(jnp.float32).reshape(n_blocks * H, H)
    return block(x_cat, w_out_full, params["b_out"], params["alpha_out"],
                 params["gamma_out"], params["beta_out"])


if __name__ == "__main__":
    num_hidden = 32
    num_layers = 3        # -> 2 residual blocks + out layer (concat dim = 64)
    batch = 32            # row-tiled into >=2 grid steps

    key = jax.random.PRNGKey(0)
    k_x, k_p = jax.random.split(key)
    x = jax.random.normal(k_x, (batch, num_hidden), jnp.float32)
    params = init_params(k_p, num_hidden, num_layers)

    ref = _reference_forward({"h": x}, params)

    # 1) Exact-semantics check: f32 MXU operands (matches PyTorch fp32 module numerics).
    out_f32 = jax.block_until_ready(
        res_mlp_encoder_forward({"h": x}, params, compute_dtype=jnp.float32))
    assert out_f32.shape == (batch, num_hidden), out_f32.shape
    err_f32 = float(jnp.max(jnp.abs(out_f32 - ref)))
    assert err_f32 < 1e-4, "f32 path mismatch vs reference, max abs err = %e" % err_f32

    # 2) Fast path: bf16 MXU operands (default), f32 epilogue — loose sanity tolerance.
    out_bf16 = jax.block_until_ready(res_mlp_encoder_forward({"h": x}, params))
    assert out_bf16.shape == (batch, num_hidden), out_bf16.shape
    assert bool(jnp.all(jnp.isfinite(out_bf16)))
    err_bf16 = float(jnp.max(jnp.abs(out_bf16 - ref)))
    assert err_bf16 < 0.5, "bf16 path too far from reference, max abs err = %e" % err_bf16

    print("KERNEL_OK")
</pallas_src>

<mosaic_0001>
module attributes {stable_mosaic.version = 11 : i64} {
  func.func @_res_mlp_kernel(%arg0: i32, %arg1: memref<8x32xf32, #tpu.memory_space<vmem>>, %arg2: memref<2x32x32xf32, #tpu.memory_space<vmem>>, %arg3: memref<2x1x32xf32, #tpu.memory_space<vmem>>, %arg4: memref<2x1x32xf32, #tpu.memory_space<vmem>>, %arg5: memref<2x1x32xf32, #tpu.memory_space<vmem>>, %arg6: memref<2x32x32xf32, #tpu.memory_space<vmem>>, %arg7: memref<1x32xf32, #tpu.memory_space<vmem>>, %arg8: memref<1x32xf32, #tpu.memory_space<vmem>>, %arg9: memref<1x32xf32, #tpu.memory_space<vmem>>, %arg10: memref<3xf32, #tpu.memory_space<smem>>, %arg11: memref<8x32xf32, #tpu.memory_space<vmem>>) attributes {dimension_semantics = [#tpu.dimension_semantics<parallel>], iteration_bounds = array<i64: 4>, scalar_prefetch = 0 : i64, scratch_operands = 0 : i64, tpu.core_type = #tpu.core_type<tc>, window_params = [{transform_indices = @transform_0, window_bounds = array<i64: 8, 32>}, {pipeline_mode = #tpu.pipeline_mode<synchronous>, transform_indices = @transform_1, window_bounds = array<i64: 2, 32, 32>}, {pipeline_mode = #tpu.pipeline_mode<synchronous>, transform_indices = @transform_2, window_bounds = array<i64: 2, 1, 32>}, {pipeline_mode = #tpu.pipeline_mode<synchronous>, transform_indices = @transform_3, window_bounds = array<i64: 2, 1, 32>}, {pipeline_mode = #tpu.pipeline_mode<synchronous>, transform_indices = @transform_4, window_bounds = array<i64: 2, 1, 32>}, {pipeline_mode = #tpu.pipeline_mode<synchronous>, transform_indices = @transform_5, window_bounds = array<i64: 2, 32, 32>}, {pipeline_mode = #tpu.pipeline_mode<synchronous>, transform_indices = @transform_6, window_bounds = array<i64: 1, 32>}, {pipeline_mode = #tpu.pipeline_mode<synchronous>, transform_indices = @transform_7, window_bounds = array<i64: 1, 32>}, {pipeline_mode = #tpu.pipeline_mode<synchronous>, transform_indices = @transform_8, window_bounds = array<i64: 1, 32>}, {transform_indices = @transform_9, window_bounds = array<i64: 3>}, {transform_indices = @transform_10, window_bounds = array<i64: 8, 32>}]} {
    %c0 = arith.constant 0 : index
    %c0_0 = arith.constant 0 : index
    %0 = vector.load %arg1[%c0, %c0_0] : memref<8x32xf32, #tpu.memory_space<vmem>>, vector<8x32xf32>
    %c0_1 = arith.constant 0 : index
    %c0_2 = arith.constant 0 : index
    %c0_3 = arith.constant 0 : index
    %1 = vector.load %arg2[%c0_1, %c0_2, %c0_3] : memref<2x32x32xf32, #tpu.memory_space<vmem>>, vector<1x32x32xf32>
    %2 = vector.shape_cast %1 : vector<1x32x32xf32> to vector<32x32xf32>
    %cst = arith.constant dense<0.000000e+00> : vector<8x32xf32>
    %3 = tpu.matmul %0, %2, %cst {dimension_numbers = #tpu.dot_dimension_numbers<[1], [0], [0], [1], [0, 0, 1, 1], [], []>} : vector<8x32xf32>, vector<32x32xf32>, vector<8x32xf32> -> vector<8x32xf32>
    %c0_4 = arith.constant 0 : index
    %c0_5 = arith.constant 0 : index
    %c0_6 = arith.constant 0 : index
    %4 = vector.load %arg3[%c0_4, %c0_5, %c0_6] : memref<2x1x32xf32, #tpu.memory_space<vmem>>, vector<1x1x32xf32>
    %5 = vector.shape_cast %4 : vector<1x1x32xf32> to vector<1x32xf32>
    %6 = vector.broadcast %5 : vector<1x32xf32> to vector<8x32xf32>
    %7 = arith.addf %3, %6 : vector<8x32xf32>
    %c0_7 = arith.constant 0 : index
    %8 = memref.load %arg10[%c0_7] : memref<3xf32, #tpu.memory_space<smem>>
    %cst_8 = arith.constant 0.000000e+00 : f32
    %9 = vector.broadcast %cst_8 : f32 to vector<8x32xf32>
    %10 = arith.cmpf ogt, %7, %9 : vector<8x32xf32>
    %11 = vector.broadcast %8 : f32 to vector<8x32xf32>
    %12 = arith.mulf %11, %7 : vector<8x32xf32>
    %13 = arith.select %10, %7, %12 : vector<8x32xi1>, vector<8x32xf32>
    %c0_9 = arith.constant 0 : index
    %c0_10 = arith.constant 0 : index
    %c0_11 = arith.constant 0 : index
    %14 = vector.load %arg4[%c0_9, %c0_10, %c0_11] : memref<2x1x32xf32, #tpu.memory_space<vmem>>, vector<1x1x32xf32>
    %15 = vector.shape_cast %14 : vector<1x1x32xf32> to vector<1x32xf32>
    %c0_12 = arith.constant 0 : index
    %c0_13 = arith.constant 0 : index
    %c0_14 = arith.constant 0 : index
    %16 = vector.load %arg5[%c0_12, %c0_13, %c0_14] : memref<2x1x32xf32, #tpu.memory_space<vmem>>, vector<1x1x32xf32>
    %17 = vector.shape_cast %16 : vector<1x1x32xf32> to vector<1x32xf32>
    %cst_15 = arith.constant dense<0.000000e+00> : vector<8xf32>
    %18 = vector.multi_reduction <add>, %13, %cst_15 [1] : vector<8x32xf32> to vector<8xf32>
    %19 = vector.shape_cast %18 : vector<8xf32> to vector<8x1xf32>
    %cst_16 = arith.constant 3.200000e+01 : f32
    %20 = vector.broadcast %cst_16 : f32 to vector<8x1xf32>
    %21 = arith.divf %19, %20 : vector<8x1xf32>
    %22 = vector.broadcast %21 : vector<8x1xf32> to vector<8x32xf32>
    %23 = arith.subf %13, %22 : vector<8x32xf32>
    %24 = arith.mulf %23, %23 : vector<8x32xf32>
    %cst_17 = arith.constant dense<0.000000e+00> : vector<8xf32>
    %25 = vector.multi_reduction <add>, %24, %cst_17 [1] : vector<8x32xf32> to vector<8xf32>
    %26 = vector.shape_cast %25 : vector<8xf32> to vector<8x1xf32>
    %cst_18 = arith.constant 3.200000e+01 : f32
    %27 = vector.broadcast %cst_18 : f32 to vector<8x1xf32>
    %28 = arith.divf %26, %27 : vector<8x1xf32>
    %cst_19 = arith.constant 9.99999974E-6 : f32
    %29 = vector.broadcast %cst_19 : f32 to vector<8x1xf32>
    %30 = arith.addf %28, %29 : vector<8x1xf32>
    %31 = math.rsqrt %30 : vector<8x1xf32>
    %32 = vector.broadcast %31 : vector<8x1xf32> to vector<8x32xf32>
    %33 = arith.mulf %23, %32 : vector<8x32xf32>
    %34 = vector.broadcast %15 : vector<1x32xf32> to vector<8x32xf32>
    %35 = arith.mulf %33, %34 : vector<8x32xf32>
    %36 = vector.broadcast %17 : vector<1x32xf32> to vector<8x32xf32>
    %37 = arith.addf %35, %36 : vector<8x32xf32>
    %c0_20 = arith.constant 0 : index
    %c0_21 = arith.constant 0 : index
    %c0_22 = arith.constant 0 : index
    %38 = vector.load %arg6[%c0_20, %c0_21, %c0_22] : memref<2x32x32xf32, #tpu.memory_space<vmem>>, vector<1x32x32xf32>
    %39 = vector.shape_cast %38 : vector<1x32x32xf32> to vector<32x32xf32>
    %cst_23 = arith.constant dense<0.000000e+00> : vector<8x32xf32>
    %40 = tpu.matmul %37, %39, %cst_23 {dimension_numbers = #tpu.dot_dimension_numbers<[1], [0], [0], [1], [0, 0, 1, 1], [], []>} : vector<8x32xf32>, vector<32x32xf32>, vector<8x32xf32> -> vector<8x32xf32>
    %c1 = arith.constant 1 : index
    %c0_24 = arith.constant 0 : index
    %c0_25 = arith.constant 0 : index
    %41 = vector.load %arg2[%c1, %c0_24, %c0_25] : memref<2x32x32xf32, #tpu.memory_space<vmem>>, vector<1x32x32xf32>
    %42 = vector.shape_cast %41 : vector<1x32x32xf32> to vector<32x32xf32>
    %cst_26 = arith.constant dense<0.000000e+00> : vector<8x32xf32>
    %43 = tpu.matmul %37, %42, %cst_26 {dimension_numbers = #tpu.dot_dimension_numbers<[1], [0], [0], [1], [0, 0, 1, 1], [], []>} : vector<8x32xf32>, vector<32x32xf32>, vector<8x32xf32> -> vector<8x32xf32>
    %c1_27 = arith.constant 1 : index
    %c0_28 = arith.constant 0 : index
    %c0_29 = arith.constant 0 : index
    %44 = vector.load %arg3[%c1_27, %c0_28, %c0_29] : memref<2x1x32xf32, #tpu.memory_space<vmem>>, vector<1x1x32xf32>
    %45 = vector.shape_cast %44 : vector<1x1x32xf32> to vector<1x32xf32>
    %46 = vector.broadcast %45 : vector<1x32xf32> to vector<8x32xf32>
    %47 = arith.addf %43, %46 : vector<8x32xf32>
    %c1_30 = arith.constant 1 : index
    %48 = memref.load %arg10[%c1_30] : memref<3xf32, #tpu.memory_space<smem>>
    %cst_31 = arith.constant 0.000000e+00 : f32
    %49 = vector.broadcast %cst_31 : f32 to vector<8x32xf32>
    %50 = arith.cmpf ogt, %47, %49 : vector<8x32xf32>
    %51 = vector.broadcast %48 : f32 to vector<8x32xf32>
    %52 = arith.mulf %51, %47 : vector<8x32xf32>
    %53 = arith.select %50, %47, %52 : vector<8x32xi1>, vector<8x32xf32>
    %c1_32 = arith.constant 1 : index
    %c0_33 = arith.constant 0 : index
    %c0_34 = arith.constant 0 : index
    %54 = vector.load %arg4[%c1_32, %c0_33, %c0_34] : memref<2x1x32xf32, #tpu.memory_space<vmem>>, vector<1x1x32xf32>
    %55 = vector.shape_cast %54 : vector<1x1x32xf32> to vector<1x32xf32>
    %c1_35 = arith.constant 1 : index
    %c0_36 = arith.constant 0 : index
    %c0_37 = arith.constant 0 : index
    %56 = vector.load %arg5[%c1_35, %c0_36, %c0_37] : memref<2x1x32xf32, #tpu.memory_space<vmem>>, vector<1x1x32xf32>
    %57 = vector.shape_cast %56 : vector<1x1x32xf32> to vector<1x32xf32>
    %cst_38 = arith.constant dense<0.000000e+00> : vector<8xf32>
    %58 = vector.multi_reduction <add>, %53, %cst_38 [1] : vector<8x32xf32> to vector<8xf32>
    %59 = vector.shape_cast %58 : vector<8xf32> to vector<8x1xf32>
    %cst_39 = arith.constant 3.200000e+01 : f32
    %60 = vector.broadcast %cst_39 : f32 to vector<8x1xf32>
    %61 = arith.divf %59, %60 : vector<8x1xf32>
    %62 = vector.broadcast %61 : vector<8x1xf32> to vector<8x32xf32>
    %63 = arith.subf %53, %62 : vector<8x32xf32>
    %64 = arith.mulf %63, %63 : vector<8x32xf32>
    %cst_40 = arith.constant dense<0.000000e+00> : vector<8xf32>
    %65 = vector.multi_reduction <add>, %64, %cst_40 [1] : vector<8x32xf32> to vector<8xf32>
    %66 = vector.shape_cast %65 : vector<8xf32> to vector<8x1xf32>
    %cst_41 = arith.constant 3.200000e+01 : f32
    %67 = vector.broadcast %cst_41 : f32 to vector<8x1xf32>
    %68 = arith.divf %66, %67 : vector<8x1xf32>
    %cst_42 = arith.constant 9.99999974E-6 : f32
    %69 = vector.broadcast %cst_42 : f32 to vector<8x1xf32>
    %70 = arith.addf %68, %69 : vector<8x1xf32>
    %71 = math.rsqrt %70 : vector<8x1xf32>
    %72 = vector.broadcast %71 : vector<8x1xf32> to vector<8x32xf32>
    %73 = arith.mulf %63, %72 : vector<8x32xf32>
    %74 = vector.broadcast %55 : vector<1x32xf32> to vector<8x32xf32>
    %75 = arith.mulf %73, %74 : vector<8x32xf32>
    %76 = vector.broadcast %57 : vector<1x32xf32> to vector<8x32xf32>
    %77 = arith.addf %75, %76 : vector<8x32xf32>
    %c1_43 = arith.constant 1 : index
    %c0_44 = arith.constant 0 : index
    %c0_45 = arith.constant 0 : index
    %78 = vector.load %arg6[%c1_43, %c0_44, %c0_45] : memref<2x32x32xf32, #tpu.memory_space<vmem>>, vector<1x32x32xf32>
    %79 = vector.shape_cast %78 : vector<1x32x32xf32> to vector<32x32xf32>
    %cst_46 = arith.constant dense<0.000000e+00> : vector<8x32xf32>
    %80 = tpu.matmul %77, %79, %cst_46 {dimension_numbers = #tpu.dot_dimension_numbers<[1], [0], [0], [1], [0, 0, 1, 1], [], []>} : vector<8x32xf32>, vector<32x32xf32>, vector<8x32xf32> -> vector<8x32xf32>
    %81 = arith.addf %40, %80 : vector<8x32xf32>
    %c0_47 = arith.constant 0 : index
    %c0_48 = arith.constant 0 : index
    %82 = vector.load %arg7[%c0_47, %c0_48] : memref<1x32xf32, #tpu.memory_space<vmem>>, vector<1x32xf32>
    %83 = vector.broadcast %82 : vector<1x32xf32> to vector<8x32xf32>
    %84 = arith.addf %81, %83 : vector<8x32xf32>
    %c2 = arith.constant 2 : index
    %85 = memref.load %arg10[%c2] : memref<3xf32, #tpu.memory_space<smem>>
    %cst_49 = arith.constant 0.000000e+00 : f32
    %86 = vector.broadcast %cst_49 : f32 to vector<8x32xf32>
    %87 = arith.cmpf ogt, %84, %86 : vector<8x32xf32>
    %88 = vector.broadcast %85 : f32 to vector<8x32xf32>
    %89 = arith.mulf %88, %84 : vector<8x32xf32>
    %90 = arith.select %87, %84, %89 : vector<8x32xi1>, vector<8x32xf32>
    %c0_50 = arith.constant 0 : index
    %c0_51 = arith.constant 0 : index
    %91 = vector.load %arg8[%c0_50, %c0_51] : memref<1x32xf32, #tpu.memory_space<vmem>>, vector<1x32xf32>
    %c0_52 = arith.constant 0 : index
    %c0_53 = arith.constant 0 : index
    %92 = vector.load %arg9[%c0_52, %c0_53] : memref<1x32xf32, #tpu.memory_space<vmem>>, vector<1x32xf32>
    %cst_54 = arith.constant dense<0.000000e+00> : vector<8xf32>
    %93 = vector.multi_reduction <add>, %90, %cst_54 [1] : vector<8x32xf32> to vector<8xf32>
    %94 = vector.shape_cast %93 : vector<8xf32> to vector<8x1xf32>
    %cst_55 = arith.constant 3.200000e+01 : f32
    %95 = vector.broadcast %cst_55 : f32 to vector<8x1xf32>
    %96 = arith.divf %94, %95 : vector<8x1xf32>
    %97 = vector.broadcast %96 : vector<8x1xf32> to vector<8x32xf32>
    %98 = arith.subf %90, %97 : vector<8x32xf32>
    %99 = arith.mulf %98, %98 : vector<8x32xf32>
    %cst_56 = arith.constant dense<0.000000e+00> : vector<8xf32>
    %100 = vector.multi_reduction <add>, %99, %cst_56 [1] : vector<8x32xf32> to vector<8xf32>
    %101 = vector.shape_cast %100 : vector<8xf32> to vector<8x1xf32>
    %cst_57 = arith.constant 3.200000e+01 : f32
    %102 = vector.broadcast %cst_57 : f32 to vector<8x1xf32>
    %103 = arith.divf %101, %102 : vector<8x1xf32>
    %cst_58 = arith.constant 9.99999974E-6 : f32
    %104 = vector.broadcast %cst_58 : f32 to vector<8x1xf32>
    %105 = arith.addf %103, %104 : vector<8x1xf32>
    %106 = math.rsqrt %105 : vector<8x1xf32>
    %107 = vector.broadcast %106 : vector<8x1xf32> to vector<8x32xf32>
    %108 = arith.mulf %98, %107 : vector<8x32xf32>
    %109 = vector.broadcast %91 : vector<1x32xf32> to vector<8x32xf32>
    %110 = arith.mulf %108, %109 : vector<8x32xf32>
    %111 = vector.broadcast %92 : vector<1x32xf32> to vector<8x32xf32>
    %112 = arith.addf %110, %111 : vector<8x32xf32>
    %c0_59 = arith.constant 0 : index
    %c0_60 = arith.constant 0 : index
    %113 = vector.load %arg11[%c0_59, %c0_60] : memref<8x32xf32, #tpu.memory_space<vmem>>, vector<8x32xf32>
    tpu.vector_store %arg11[%c0_59, %c0_60], %112 {strides = array<i32>} : memref<8x32xf32, #tpu.memory_space<vmem>>, vector<8x32xf32>,
    return
  }
  func.func @transform_0(%arg0: i32) -> (i32, i32) {
    %c0_i32 = arith.constant 0 : i32
    %c0_i32_0 = arith.constant 0 : i32
    return %arg0, %c0_i32 : i32, i32
  }
  func.func @transform_1(%arg0: i32) -> (i32, i32, i32) {
    %c0_i32 = arith.constant 0 : i32
    %c0_i32_0 = arith.constant 0 : i32
    %c0_i32_1 = arith.constant 0 : i32
    %c0_i32_2 = arith.constant 0 : i32
    return %c0_i32, %c0_i32_0, %c0_i32_1 : i32, i32, i32
  }
  func.func @transform_2(%arg0: i32) -> (i32, i32, i32) {
    %c0_i32 = arith.constant 0 : i32
    %c0_i32_0 = arith.constant 0 : i32
    %c0_i32_1 = arith.constant 0 : i32
    %c0_i32_2 = arith.constant 0 : i32
    return %c0_i32, %c0_i32_0, %c0_i32_1 : i32, i32, i32
  }
  func.func @transform_3(%arg0: i32) -> (i32, i32, i32) {
    %c0_i32 = arith.constant 0 : i32
    %c0_i32_0 = arith.constant 0 : i32
    %c0_i32_1 = arith.constant 0 : i32
    %c0_i32_2 = arith.constant 0 : i32
    return %c0_i32, %c0_i32_0, %c0_i32_1 : i32, i32, i32
  }
  func.func @transform_4(%arg0: i32) -> (i32, i32, i32) {
    %c0_i32 = arith.constant 0 : i32
    %c0_i32_0 = arith.constant 0 : i32
    %c0_i32_1 = arith.constant 0 : i32
    %c0_i32_2 = arith.constant 0 : i32
    return %c0_i32, %c0_i32_0, %c0_i32_1 : i32, i32, i32
  }
  func.func @transform_5(%arg0: i32) -> (i32, i32, i32) {
    %c0_i32 = arith.constant 0 : i32
    %c0_i32_0 = arith.constant 0 : i32
    %c0_i32_1 = arith.constant 0 : i32
    %c0_i32_2 = arith.constant 0 : i32
    return %c0_i32, %c0_i32_0, %c0_i32_1 : i32, i32, i32
  }
  func.func @transform_6(%arg0: i32) -> (i32, i32) {
    %c0_i32 = arith.constant 0 : i32
    %c0_i32_0 = arith.constant 0 : i32
    %c0_i32_1 = arith.constant 0 : i32
    return %c0_i32, %c0_i32_0 : i32, i32
  }
  func.func @transform_7(%arg0: i32) -> (i32, i32) {
    %c0_i32 = arith.constant 0 : i32
    %c0_i32_0 = arith.constant 0 : i32
    %c0_i32_1 = arith.constant 0 : i32
    return %c0_i32, %c0_i32_0 : i32, i32
  }
  func.func @transform_8(%arg0: i32) -> (i32, i32) {
    %c0_i32 = arith.constant 0 : i32
    %c0_i32_0 = arith.constant 0 : i32
    %c0_i32_1 = arith.constant 0 : i32
    return %c0_i32, %c0_i32_0 : i32, i32
  }
  func.func @transform_9(%arg0: i32) -> i32 {
    %c0_i32 = arith.constant 0 : i32
    %c0_i32_0 = arith.constant 0 : i32
    return %c0_i32 : i32
  }
  func.func @transform_10(%arg0: i32) -> (i32, i32) {
    %c0_i32 = arith.constant 0 : i32
    %c0_i32_0 = arith.constant 0 : i32
    return %arg0, %c0_i32 : i32, i32
  }
}

</mosaic_0001>

<bundles_post_ra>
// kernel: tpu_custom_call.1
= control target key start
LH: loop header
LB: loop body
LE: loop exit
PB: predicated region body
PF: predicated region fallthrough
CT: control target
= control target key end

     0   :  { %s1724_s0 = inlined_call_operand.hbm [shape: f32[32,32], index: 0, kind: input, shape index: {}]   ;;  %s1725_s1 = inlined_call_operand.hbm [shape: f32[2,32,32], index: 1, kind: input, shape index: {}]   ;;  %s1726_s2 = inlined_call_operand.vmem [shape: f32[2,1,32], index: 2, kind: input, shape index: {}]   ;;  %s1727_s3 = inlined_call_operand.vmem [shape: f32[2,1,32], index: 3, kind: input, shape index: {}]   ;;  %s1728_s4 = inlined_call_operand.vmem [shape: f32[2,1,32], index: 4, kind: input, shape index: {}]   ;;  %s1729_s5 = inlined_call_operand.hbm [shape: f32[2,32,32], index: 5, kind: input, shape index: {}]   ;;  %s1730_s6 = inlined_call_operand.vmem [shape: f32[1,32], index: 6, kind: input, shape index: {}]   ;;  %s1731_s7 = inlined_call_operand.vmem [shape: f32[1,32], index: 7, kind: input, shape index: {}]   ;;  %s1732_s8 = inlined_call_operand.vmem [shape: f32[1,32], index: 8, kind: input, shape index: {}]   ;;  %s1733_s9 = inlined_call_operand.vmem [shape: f32[3], index: 9, kind: input, shape index: {}]   ;;  %s1734_s10 = inlined_call_operand.hbm [shape: f32[32,32], index: 10, kind: output, shape index: {}]  }
   0x1   :  { %1741 = sst [smem:[#allocation17_spill]] %s1733_s9 }
   0x2   :  { %1742 = sst [smem:[#allocation18_spill]] %s1734_s10 }
   0x3   :  { %15 = vsyncpa [#allocation3], 0 }
   0x4   :  { %17 = vsyncpa [#allocation3 + $0x1], 0 }
   0x5   :  { %18 = vsyncpa [#allocation7], 0 }
   0x6   :  { %19 = vsyncpa [#allocation5], 0 }
   0x7   :  { %20 = vsyncpa [#allocation4], 0 }
   0x8   :  { %22 = vsyncpa [#allocation4 + $0x1], 0  ;;  %s1425_s13 = smov 0   ;;  %s1427_s14 = smov 0  }
   0x9   :  { %s1429_s15 = smov 0   ;;  %s1431_s16 = smov 0  }
   0xa LB: > { %1743 = sst [smem:[#allocation15_spill]] %s1346_s13  ;;  %s1446_s17 = sadd.s32 4294967295, %s1358_s16   ;;  %s1358_s16 = sphi %s1431_s16, %s1767_s16   ;;  %s1354_s15 = sphi %s1429_s15, %s1766_s15   ;;  %s1350_s14 = sphi %s1427_s14, %s1765_s14   ;;  %s1346_s13 = sphi %s1425_s13, %s1764_s13  }
   0xb   : > { %s971_s18 = sadd.s32 4294967294, %s1358_s16   ;;  %p48_p0 = scmp.ne.s32.totalorder %s1350_s14, %s1346_s13 }
   0xc   : > { %p1736_p1 = scmp.eq.s32.totalorder %s1446_s17, 0  ;;  %p267_p3 = scmp.eq.s32.totalorder %s971_s18, 3 }
   0xd   : > { %p972_p5 = scmp.ge.s32.totalorder %s1358_s16, 1  ;;  %p274_p7 = scmp.lt.s32.totalorder %s1358_s16, 5 }
   0xe   : > { %p1455_p4 = por %p1736_p1, %p48_p0  ;;  %p1460_p6 = por %p267_p3, %p48_p0 }
   0xf   : > { %p1465_p8 = pnand %p972_p5, %p274_p7  ;;  %s1360_s22 = smov [#allocation6]  }
  0x10   : > { %s1744_s19 = scalar_select %p1455_p4, 1, 0 }
  0x11   : > { %s1745_s20 = scalar_select %p1460_p6, 1, 0 }
  0x12   : > { %s286_s23 = sshll.u32 %s1360_s22, 4  ;;  %p1111_p9 = pneg %p1465_p8  ;;  %s1469_s23 = int_to_ptr.vmem [resolvable:$true] %s286_s23 }
  0x13   : > { %1746 = sst [smem:[#allocation16_spill]] %s1745_s20  ;;  %s1361_s25 = smov [#allocation8]  }
  0x14   : > { %p1475_p10 = pnand %p1111_p9, %p1736_p1  ;;  %s308_s26 = sshll.u32 %s1361_s25, 4  ;;  %s1479_s26 = int_to_ptr.vmem [resolvable:$true] %s308_s26 }
  0x15   : > { %s1749_s9 = sld [smem:[#allocation17_spill]]  ;;  %s1183_s12 = scalar_lea.hbm %s1725_s1, 1024 }
  0x16   : > { %p1184_p11 = scmp.ne.s32.totalorder %s1725_s1, %s1183_s12  ;;  %p1494_p12 = pneg %p1475_p10 }
  0x17   : > { %p1190_p3 = scmp.lt.u32.totalorder %s1183_s12, %s1725_s1 }
  0x18   : > { %p1186_p13 = pnand %p1494_p12, %p1184_p11 }
  0x1a   : > { %p1187_p0 = pneg %p1186_p13 }
  0x1b   : > { %s331_s29 = sshll.u32 %s1749_s9, 4  ;;  %s1484_s29 = int_to_ptr.vmem [resolvable:$true] %s331_s29 }
  0x1c   : > { %p1192_p5 = pnand %p1190_p3, %p1187_p0 }
  0x1e   : > { %1195 = shalt.err (!%p1192_p5)
}
  0x1f   : > { %s1196_s28 = scalar_lea.vmem %s1469_s23, 1024  ;;  %p1204_p2 = scmp.lt.s32.totalorder %s1469_s23, %s1469_s23 }
  0x20   : > { %p1197_p7 = scmp.ne.s32.totalorder %s1469_s23, %s1196_s28  ;;  %p1205_p6 = scmp.lt.s32.totalorder %s1196_s28, %s1196_s28 }
  0x22   : > { %p1199_p9 = pnand %p1197_p7, %p1494_p12  ;;  %p1206_p11 = por %p1205_p6, %p1204_p2 }
  0x24   : > { %p1200_p1 = pneg %p1199_p9 }
  0x26   : > { %p1207_p13 = pnand %p1206_p11, %p1200_p1 }
  0x28   : > { %1210 = shalt.err (!%p1207_p13)
}
  0x29   : > { %s1362_s30 = smov 128   ;;  %s1363_s11 = smov 8  }
  0x2a   : > { %1114 = dma.hbm_to_vmem [thread:$0]  (!%p1475_p10), %s1725_s1, 1024, %s1469_s23, [#allocation7], %s1362_s30, %s1362_s30, %s1363_s11  }
  0x2b   : > { %s1211_s27 = scalar_lea.hbm %s1729_s5, 1024 }
  0x2c   : > { %p1212_p2 = scmp.ne.s32.totalorder %s1729_s5, %s1211_s27  ;;  %p1218_p0 = scmp.lt.u32.totalorder %s1211_s27, %s1729_s5 }
  0x2e   : > { %p1214_p1 = pnand %p1212_p2, %p1494_p12 }
  0x30   : > { %p1215_p6 = pneg %p1214_p1 }
  0x32   : > { %p1220_p3 = pnand %p1218_p0, %p1215_p6 }
  0x34   : > { %1223 = shalt.err (!%p1220_p3)
}
  0x35   : > { %s1224_s23 = scalar_lea.vmem %s1479_s26, 1024  ;;  %p1232_p11 = scmp.lt.s32.totalorder %s1479_s26, %s1479_s26 }
  0x36   : > { %p1225_p5 = scmp.ne.s32.totalorder %s1479_s26, %s1224_s23  ;;  %p1233_p13 = scmp.lt.s32.totalorder %s1224_s23, %s1224_s23 }
  0x38   : > { %p1227_p7 = pnand %p1225_p5, %p1494_p12  ;;  %p1234_p2 = por %p1233_p13, %p1232_p11 }
  0x3a   : > { %p1228_p9 = pneg %p1227_p7 }
  0x3c   : > { %p1235_p1 = pnand %p1234_p2, %p1228_p9 }
  0x3e   : > { %1238 = shalt.err (!%p1235_p1)
}
  0x3f   : > { %1117 = dma.hbm_to_vmem [thread:$0]  (!%p1475_p10), %s1729_s5, 1024, %s1479_s26, [#allocation7], %s1362_s30, %s1362_s30, %s1363_s11  }
  0x40   : > { %s1239_s13 = scalar_lea.vmem %s1484_s29, 16  ;;  %p1247_p5 = scmp.lt.s32.totalorder %s1484_s29, %s1484_s29 }
  0x41   : > { %p1240_p6 = scmp.ne.s32.totalorder %s1484_s29, %s1239_s13  ;;  %p1248_p7 = scmp.lt.s32.totalorder %s1239_s13, %s1239_s13 }
  0x43   : > { %p1242_p0 = pnand %p1240_p6, %p1494_p12  ;;  %p1249_p9 = por %p1248_p7, %p1247_p5 }
  0x45   : > { %p1243_p3 = pneg %p1242_p0 }
  0x47   : > { %p1250_p11 = pnand %p1249_p9, %p1243_p3 }
  0x49   : > { %1253 = shalt.err (!%p1250_p11)
}
  0x4a   : > { %s1364_s12 = smov [#allocation9]   ;;  %s1548_s20 = sadd.s32 1, %s1358_s16  }
  0x4b   : > { %1120 = dma.vmem_to_smem (!%p1475_p10), %s1484_s29, 16, %s1364_s12, [#allocation5]  }
  0x4c   : > { %s32_s26 = ssub.s32 %s1358_s16, %s1548_s20  ;;  %s35_s30 = sadd.s32 1, %s1354_s15 }
  0x4d   : > { %p33_p12 = scmp.eq.s32.totalorder %s32_s26, 0  ;;  %p42_p13 = scmp.ne.s32.totalorder %s1354_s15, %s1350_s14 }
  0x4e   : > { %p43_p2 = scmp.eq.s32.totalorder %s1358_s16, 0  ;;  %p1132_p1 = scmp.lt.s32.totalorder %s1358_s16, 4 }
  0x4f   : > { %s1558_s24 = scalar_select %p33_p12, %s1354_s15, %s35_s30  }
  0x50   : > { %p44_p6 = por %p43_p2, %p42_p13  ;;  %p1751_p0 = scmp.eq.s32.totalorder %s1446_s17, 3 }
  0x51   : > { %s342_s18 = sand.u32 1, %s1354_s15   ;;  %s978_s22 = sshll.u32 %s1358_s16, 7 }
  0x52   : > { %p1562_p3 = por %p1751_p0, %p42_p13  ;;  %s977_s29 = sshll.u32 %s342_s18, 3 }
  0x53   : > { %s1571_s28 = scalar_lea.hbm %s1724_s0, %s978_s22  ;;  %s346_s23 = scalar_lea.vmem [#allocation2], %s977_s29 }
  0x54   : > { %s1752_s11 = scalar_select %p1562_p3, 1, 0 }
  0x55   : > { %s353_s9 = sshll.u32 %s346_s23, 4  ;;  %p1573_p10 = pnand %p1132_p1, %p44_p6  ;;  %s1577_s9 = int_to_ptr.vmem [resolvable:$true] %s353_s9 }
  0x56   : > { %s343_s13 = scalar_lea.sflag [#allocation3], %s342_s18  ;;  %s1254_s12 = scalar_lea.hbm %s1571_s28, 128 }
  0x57   : > { %p1255_p5 = scmp.ne.s32.totalorder %s1571_s28, %s1254_s12  ;;  %p1256_p7 = pneg %p1573_p10 }
  0x58   : > { %s1259_s22 = scalar_lea.hbm %s1724_s0, 512  ;;  %p1260_p12 = scmp.lt.u32.totalorder %s1571_s28, %s1724_s0 }
  0x59   : > { %p1257_p9 = pnand %p1256_p7, %p1255_p5  ;;  %p1261_p13 = scmp.lt.u32.totalorder %s1259_s22, %s1254_s12 }
  0x5a   : > { %p1263_p1 = scmp.lt.u32.totalorder %s1254_s12, %s1571_s28 }
  0x5b   : > { %p1258_p11 = pneg %p1257_p9  ;;  %p1262_p2 = por %p1261_p13, %p1260_p12 }
  0x5d   : > { %p1264_p6 = por %p1263_p1, %p1262_p2 }
  0x5f   : > { %p1265_p0 = pnand %p1264_p6, %p1258_p11 }
  0x61   : > { %1268 = shalt.err (!%p1265_p0)
}
  0x62   : > { %s1269_s18 = scalar_lea.vmem %s1577_s9, 128  ;;  %s1365_s27 = smov [#allocation2]  }
  0x63   : > { %p1270_p5 = scmp.ne.s32.totalorder %s1577_s9, %s1269_s18  ;;  %s1274_s23 = sshll.u32 %s1365_s27, 4  ;;  %s1275_s23 = int_to_ptr.vmem [resolvable:$false] %s1274_s23 }
  0x64   : > { %s1276_s26 = scalar_lea.vmem %s1275_s23, 256  ;;  %p1277_p4 = scmp.lt.s32.totalorder %s1577_s9, %s1275_s23 }
  0x65   : > { %p1272_p9 = pnand %p1270_p5, %p1256_p7  ;;  %p1278_p12 = scmp.lt.s32.totalorder %s1276_s26, %s1269_s18 }
  0x67   : > { %p1273_p3 = pneg %p1272_p9  ;;  %p1279_p13 = por %p1278_p12, %p1277_p4 }
  0x69   : > { %p1280_p2 = pnand %p1279_p13, %p1273_p3 }
  0x6b   : > { %1283 = shalt.err (!%p1280_p2)
}
  0x6c   : > { %1124 = dma.hbm_to_vmem [thread:$0]  (!%p1573_p10), %s1571_s28, 128, %s1577_s9, %s343_s13  }
  0x6d   : > { %362 = sbr.rel (%p1465_p8) target bundleno = 1742 (0x6ce), region = 60  ;;  %s1607_s12 = sand.u32 (!%p1465_p8), 1, %s1350_s14  }
  0x6e   : > { %s980_s30 = sshll.u32 (!%p1465_p8), %s1607_s12, 3  ;;  %s365_s22 = scalar_lea.sflag (!%p1465_p8), [#allocation3], %s1607_s12 }
  0x6f   : > { %s368_s29 = scalar_lea.vmem (!%p1465_p8), [#allocation2], %s980_s30  ;;  %p1754_p4 = scmp.ne.s32.totalorder (!%p1465_p8), %s1744_s19, 0 }
  0x74   : > { %1329 = dma.done.wait (%p1754_p4), %s365_s22, 128  }
  0x75   : > { %1331 = vsyncadd (%p1754_p4), %s365_s22, 4294967168  ;;  %p1755_p3 = scmp.eq.s32.totalorder %s1446_s17, 0 }
  0x77   : > { %1333 = dma.done.wait (%p1755_p3), [#allocation7], 2048   ;;  %p1756_p8 = pmov %p1755_p3 }
  0x78   : > { %p1757_p10 = pmov %p1755_p3 }
  0x79   : > { %1335 = vsyncadd (%p1756_p8), [#allocation7], 4294965248 }
  0x7a   : > { %1337 = dma.done.wait (%p1757_p10), [#allocation5], 16   ;;  %p1758_p7 = pmov %p1755_p3 }
  0x7c   : > { %1339 = vsyncadd (%p1758_p7), [#allocation5], 4294967280 }
  0x7d   : > { %385 = sfence }
  0x7e   : > { %v419_v0 = vld [vmem:[#allocation6] sm:$0xff]  ;;  %v420_v1 = vld [vmem:[#allocation6 + $0x8] sm:$0xff]  ;;  %v421_v2 = vld [vmem:[#allocation6 + $0x10] sm:$0xff]  ;;  %v1366_v3 = vmov 0.0|0.0   ;;  %vm1367_vm0 = vmmov 0   ;;  %v1368_v6 = vmov 0.0  }
  0x7f   : > { %1071 = vmatprep.subr.bf16.mxu0 %v1366_v3  ;;  %v1072_v4 = vpack.c.bf16 %v420_v1, %v419_v0  ;;  %v422_v5 = vld [vmem:[#allocation6 + $0x18] sm:$0xff]  ;;  %1035 = vmatprep.mubr.msk.f32.mxu0 %vm1367_vm0, %v1368_v6  ;;  %vm430_vm1 = vcmask 261120   ;;  %s504_s19 = sld [smem:[#allocation9]]  ;;  %v985_v9 = vld [vmem:[%s1726_s2] ss:$0 sm:$0xff]  ;;  %v544_v22 = vld [vmem:[#allocation6 + $0x20] sm:$0xff] }
  0x80   : > { %1077 = vmatprep.subr.bf16.mxu1 %v1366_v3  ;;  %1046 = vmatprep.mubr.msk.f32.mxu1 %vm1367_vm0, %v1368_v6  ;;  %v1075_v7 = vpack.c.bf16 %v422_v5, %v421_v2  ;;  %v418_v8 = vld [vmem:[%s368_s29] sm:$0xff]  ;;  %v545_v23 = vld [vmem:[#allocation6 + $0x28] sm:$0xff]  ;;  %v539_v34 = vld [vmem:[#allocation8] sm:$0xff]  ;;  %s992_s18 = sld [smem:[#allocation9 + $0x1]]  ;;  %s1000_s21 = sld [smem:[#allocation9 + $0x2]] }
  0x81   : > { %1073 = vmatpush3.bf16.msra.mxu0 %v1072_v4  ;;  %v546_v24 = vld [vmem:[#allocation6 + $0x30] sm:$0xff]  ;;  %v1078_v25 = vpack.c.bf16 %v545_v23, %v544_v22  ;;  %v547_v26 = vld [vmem:[#allocation6 + $0x38] sm:$0xff]  ;;  %v540_v35 = vld [vmem:[#allocation8 + $0x8] sm:$0xff]  ;;  %s1004_s27 = sshll.u32 %s1446_s17, 7  ;;  %s417_s23 = scalar_lea.vmem [#allocation10], %s980_s30 }
  0x82   : > { %1074 = vmatprep.subr.bf16.mxu0 %v1366_v3  ;;  %v1081_v27 = vpack.c.bf16 %v547_v26, %v546_v24  ;;  %v987_v32 = vld [vmem:[%s1727_s3] ss:$0 sm:$0xff]  ;;  %v1090_v38 = vpack.c.bf16 %v540_v35, %v539_v34  ;;  %v542_v41 = vld [vmem:[#allocation8 + $0x18] sm:$0xff]  ;;  %v990_v43 = vld [vmem:[%s1726_s2 + $0x1] ss:$0 sm:$0xff]  ;;  %s870_s26 = sshll.u32 %s417_s23, 4  ;;  %s1682_s26 = int_to_ptr.vmem [resolvable:$true] %s870_s26 }
  0x83   : > { %1079 = vmatpush3.bf16.msra.mxu1 %v1078_v25  ;;  %v988_v36 = vld [vmem:[%s1728_s4] ss:$0 sm:$0xff]  ;;  %v666_v58 = vld [vmem:[#allocation8 + $0x20] sm:$0xff]  ;;  %v667_v59 = vld [vmem:[#allocation8 + $0x28] sm:$0xff]  ;;  %s857_s28 = scalar_lea.sflag [#allocation4], %s1607_s12  ;;  %s1284_s9 = scalar_lea.vmem %s1682_s26, 128 }
  0x84   : > { %1080 = vmatprep.subr.bf16.mxu1 %v1366_v3  ;;  %v541_v40 = vld [vmem:[#allocation8 + $0x10] sm:$0xff]  ;;  %v1084_v60 = vpack.c.bf16 %v667_v59, %v666_v58  ;;  %v669_v62 = vld [vmem:[#allocation8 + $0x38] sm:$0xff]  ;;  %p1285_p11 = scmp.ne.s32.totalorder %s1682_s26, %s1284_s9  ;;  %p1760_p1 = scmp.ne.s32.totalorder %s1752_s11, 0 }
  0x85   : > { %1076 = vmatpush3.bf16.msra.mxu0 %v1075_v7  ;;  %v506_v11 = vstv %s504_s19  ;;  %v1093_v42 = vpack.c.bf16 %v542_v41, %v541_v40  ;;  %v668_v61 = vld [vmem:[#allocation8 + $0x30] sm:$0xff]  ;;  %s1759_s19 = sld [smem:[#allocation18_spill]]  ;;  %s1369_s17 = smov [#allocation10]  }
  0x86   : > { %1083 = vmatprep.subr.bf16.mxu0 %v1366_v3  ;;  %v631_v45 = vstv %s992_s18  ;;  %v1087_v63 = vpack.c.bf16 %v669_v62, %v668_v61  ;;  %v995_v5 = vld [vmem:[%s1727_s3 + $0x1] ss:$0 sm:$0xff]  ;;  %p1286_p6 = pnand %p1285_p11, %p1760_p1  ;;  %s1288_s30 = sshll.u32 %s1369_s17, 4  ;;  %s1289_s30 = int_to_ptr.vmem [resolvable:$false] %s1288_s30 }
  0x87   : > { %1082 = vmatpush3.bf16.msra.mxu1 %v1081_v27  ;;  %v996_v7 = vld [vmem:[%s1728_s4 + $0x1] ss:$0 sm:$0xff]  ;;  %v1001_v27 = vld [vmem:[%s1731_s7] ss:$0 sm:$0xff]  ;;  %s1290_s10 = scalar_lea.vmem %s1289_s30, 256  ;;  %p1291_p5 = scmp.lt.s32.totalorder %s1682_s26, %s1289_s30 }
  0x88   : > { %1036 = vmatmul.mubr.msk.f32.vlgmr.msra.gmra.mrb[0].mxu0 %vm430_vm1, %v418_v8  ;;  %1089 = vmatprep.subr.bf16.mxu1 %v1366_v3  ;;  %p1287_p0 = pneg %p1286_p6  ;;  %p1292_p9 = scmp.lt.s32.totalorder %s1290_s10, %s1284_s9 }
  0x89   : > { %1057 = vmatprep.mubr.msk.f32.mxu0 %vm1367_vm0, %v1368_v6  ;;  %1085 = vmatpush3.bf16.msra.mxu0 %v1084_v60 }
  0x8a   : > { %1086 = vmatprep.subr.bf16.mxu0 %v1366_v3  ;;  %p1293_p12 = por %p1292_p9, %p1291_p5 }
  0x8c   : > { %p1294_p13 = pnand %p1293_p12, %p1287_p0 }
  0x8d   : > { %1088 = vmatpush3.bf16.msra.mxu0 %v1087_v63 }
 0x15b   : > { %v500_v10 = vpop.f32.mrb[0].mxu0 }
 0x15c   : > { %v501_v12 = vadd.f32 %v985_v9, %v500_v10  ;;  %v1037_v13 = vpop.f32.mrb[1].mxu0  ;;  %v999_v10 = vld [vmem:[%s1730_s6] ss:$0 sm:$0xff] }
 0x15d   : > { %v823_v13 = vstv %s1000_s21  ;;  %s1680_s21 = scalar_lea.hbm %s1759_s19, %s1004_s27 }
 0x15e   : > { %v507_v14 = vmul.f32 %v506_v11, %v501_v12  ;;  %vm505_vm2 = vcmp.gt.f32.partialorder %v501_v12, 0.0 }
 0x160   : > { %v508_v15 = vsel %vm505_vm2, %v501_v12, %v507_v14 }
 0x161   : > { %v511_v16 = vsel %vm430_vm1, %v508_v15, 0.0 }
 0x162   : > { %512 = vadd.xlane.f32.xlu0 %v511_v16 }
 0x1ef   : > { %v513_v17 = vpop.xlane.xlu0 %512 }
 0x1f0   : > { %v515_v18 = vmul.f32 0.03125, %v513_v17 }
 0x1f2   : > { %v516_v19 = vsub.f32 %v508_v15, %v515_v18 }
 0x1f4   : > { %v517_v20 = vmul.f32 %v516_v19, %v516_v19 }
 0x1f6   : > { %v518_v21 = vsel %vm430_vm1, %v517_v20, 0.0 }
 0x1f7   : > { %519 = vadd.xlane.f32.xlu0 %v518_v21 }
 0x284   : > { %v520_v28 = vpop.xlane.xlu0 %519 }
 0x285   : > { %v521_v29 = vmul.f32 0.03125, %v520_v28 }
 0x287   : > { %v522_v30 = vadd.f32 1e-05, %v521_v29  ;;  %v1002_v29 = vld [vmem:[%s1732_s8] ss:$0 sm:$0xff] }
 0x289   : > { %1177 = vrsqrt.f32 %v522_v30 }
 0x293   : > { %v1178_v31 = vpop.eup %1177 }
 0x294   : > { %v524_v33 = vmul.f32 %v1178_v31, %v516_v19 }
 0x296   : > { %v531_v37 = vmul.f32 %v987_v32, %v524_v33 }
 0x298   : > { %v538_v39 = vadd.f32 %v988_v36, %v531_v37 }
 0x29a   : > { %1047 = vmatmul.mubr.msk.f32.vlgmr.msra.gmra.mrb[0].mxu1 %vm430_vm1, %v538_v39 }
 0x29b   : > { %1091 = vmatpush3.bf16.msra.mxu1 %v1090_v38  ;;  %1068 = vmatprep.mubr.msk.f32.mxu1 %vm1367_vm0, %v1368_v6 }
 0x29c   : > { %1092 = vmatprep.subr.bf16.mxu1 %v1366_v3 }
 0x29f   : > { %1094 = vmatpush3.bf16.msra.mxu1 %v1093_v42 }
 0x2a2   : > { %1069 = vmatmul.mubr.msk.f32.vlgmr.msra.gmra.mrb[2].mxu1 %vm430_vm1, %v538_v39 }
 0x36d   : > { %v625_v44 = vpop.f32.mrb[0].mxu1 }
 0x36e   : > { %v626_v46 = vadd.f32 %v990_v43, %v625_v44  ;;  %v1048_v47 = vpop.f32.mrb[1].mxu1 }
 0x370   : > { %v632_v48 = vmul.f32 %v631_v45, %v626_v46  ;;  %vm630_vm3 = vcmp.gt.f32.partialorder %v626_v46, 0.0 }
 0x372   : > { %v633_v49 = vsel %vm630_vm3, %v626_v46, %v632_v48 }
 0x373   : > { %v638_v50 = vsel %vm430_vm1, %v633_v49, 0.0 }
 0x374   : > { %639 = vadd.xlane.f32.xlu1 %v638_v50 }
 0x375   : > { %v809_v51 = vpop.f32.mrb[2].mxu1 }
 0x376   : > { %v1070_v52 = vpop.f32.mrb[3].mxu1 }
 0x401   : > { %v640_v53 = vpop.xlane.xlu1 %639 }
 0x402   : > { %v641_v54 = vmul.f32 0.03125, %v640_v53 }
 0x404   : > { %v642_v55 = vsub.f32 %v633_v49, %v641_v54 }
 0x406   : > { %v643_v56 = vmul.f32 %v642_v55, %v642_v55 }
 0x408   : > { %v644_v57 = vsel %vm430_vm1, %v643_v56, 0.0 }
 0x409   : > { %645 = vadd.xlane.f32.xlu1 %v644_v57 }
 0x496   : > { %v646_v0 = vpop.xlane.xlu1 %645 }
 0x497   : > { %v647_v1 = vmul.f32 0.03125, %v646_v0 }
 0x499   : > { %v648_v2 = vadd.f32 1e-05, %v647_v1 }
 0x49b   : > { %1179 = vrsqrt.f32 %v648_v2 }
 0x4a5   : > { %v1180_v4 = vpop.eup %1179 }
 0x4a6   : > { %v650_v6 = vmul.f32 %v1180_v4, %v642_v55 }
 0x4a8   : > { %v657_v8 = vmul.f32 %v995_v5, %v650_v6 }
 0x4aa   : > { %v664_v9 = vadd.f32 %v996_v7, %v657_v8 }
 0x4ac   : > { %1058 = vmatmul.mubr.msk.f32.vlgmr.msra.gmra.mrb[2].mxu0 %vm430_vm1, %v664_v9 }
 0x57f   : > { %v739_v3 = vpop.f32.mrb[2].mxu0 }
 0x580   : > { %v810_v11 = vadd.f32 %v809_v51, %v739_v3  ;;  %v1059_v12 = vpop.f32.mrb[3].mxu0 }
 0x582   : > { %v820_v14 = vadd.f32 %v999_v10, %v810_v11 }
 0x584   : > { %vm822_vm4 = vcmp.gt.f32.partialorder %v820_v14, 0.0  ;;  %v824_v15 = vmul.f32 %v823_v13, %v820_v14 }
 0x586   : > { %v825_v16 = vsel %vm822_vm4, %v820_v14, %v824_v15 }
 0x587   : > { %v828_v17 = vsel %vm430_vm1, %v825_v16, 0.0 }
 0x588   : > { %829 = vadd.xlane.f32.xlu0 %v828_v17 }
 0x615   : > { %v830_v18 = vpop.xlane.xlu0 %829 }
 0x616   : > { %v831_v19 = vmul.f32 0.03125, %v830_v18 }
 0x618   : > { %v832_v20 = vsub.f32 %v825_v16, %v831_v19 }
 0x61a   : > { %v833_v21 = vmul.f32 %v832_v20, %v832_v20 }
 0x61c   : > { %v834_v22 = vsel %vm430_vm1, %v833_v21, 0.0 }
 0x61d   : > { %835 = vadd.xlane.f32.xlu1 %v834_v22 }
 0x6aa   : > { %v836_v23 = vpop.xlane.xlu1 %835 }
 0x6ab   : > { %v837_v24 = vmul.f32 0.03125, %v836_v23 }
 0x6ad   : > { %v838_v25 = vadd.f32 1e-05, %v837_v24 }
 0x6af   : > { %1181 = vrsqrt.f32 %v838_v25 }
 0x6b9   : > { %v1182_v26 = vpop.eup %1181 }
 0x6ba   : > { %v840_v28 = vmul.f32 %v1182_v26, %v832_v20 }
 0x6bc   : > { %v847_v30 = vmul.f32 %v1001_v27, %v840_v28 }
 0x6be   : > { %v854_v31 = vadd.f32 %v1002_v29, %v847_v30 }
 0x6c0   : > { %855 = vst.msk [vmem:[%s417_s23] sm:$0xff] %vm430_vm1, %v854_v31 }
 0x6c1   : > { %1297 = shalt.err (!%p1294_p13)
}
 0x6c2   : > { %s1298_s12 = scalar_lea.hbm %s1680_s21, 128  ;;  %s1302_s18 = scalar_lea.hbm %s1759_s19, 512 }
 0x6c3   : > { %p1299_p2 = scmp.ne.s32.totalorder %s1680_s21, %s1298_s12  ;;  %p1303_p8 = scmp.lt.u32.totalorder %s1680_s21, %s1759_s19 }
 0x6c4   : > { %p1304_p10 = scmp.lt.u32.totalorder %s1302_s18, %s1298_s12  ;;  %p1306_p11 = scmp.lt.u32.totalorder %s1298_s12, %s1680_s21 }
 0x6c5   : > { %p1300_p4 = pnand %p1299_p2, %p1760_p1 }
 0x6c6   : > { %p1305_p7 = por %p1304_p10, %p1303_p8 }
 0x6c7   : > { %p1301_p3 = pneg %p1300_p4 }
 0x6c8   : > { %p1307_p6 = por %p1306_p11, %p1305_p7 }
 0x6ca   : > { %p1308_p0 = pnand %p1307_p6, %p1301_p3 }
 0x6cc   : > { %1311 = shalt.err (!%p1308_p0)
}
 0x6cd   : > { %1109 = dma.vmem_to_hbm [thread:$0]  (%p1760_p1), %s1682_s26, 128, %s1680_s21, %s857_s28  }
 0x6ce PF: > { %s1761_s22 = sld [smem:[#allocation15_spill]]  ;;  %s1762_s29 = sld [smem:[#allocation16_spill]] }
 0x6cf   : > { %p1136_p5 = scmp.ge.s32.totalorder %s1358_s16, 2 }
 0x6d4   : > { %s882_s9 = sand.u32 1, %s1761_s22   ;;  %p1763_p9 = scmp.ne.s32.totalorder %s1762_s29, 0 }
 0x6d5   : > { %s883_s17 = scalar_lea.sflag [#allocation4], %s882_s9 }
 0x6d6   : > { %p1126_p12 = pnand %p1136_p5, %p1763_p9 }
 0x6d8   : > { %1341 = dma.done.wait (!%p1126_p12), %s883_s17, 128  }
 0x6d9   : > { %1343 = vsyncadd (!%p1126_p12), %s883_s17, 4294967168  ;;  %p25_p13 = scmp.ge.s32.totalorder %s1548_s20, 6   ;;  %s1764_s13 = smov %s1350_s14 }
 0x6da   : > { %s1765_s14 = smov %s1354_s15  ;;  %s1766_s15 = smov %s1558_s24 }
 0x6db   : > { %s1767_s16 = smov %s1548_s20  ;;  %27 = sbr.rel (!%p25_p13) target bundleno = 10 (0xa), region = 123 }
 0x6e2   :  { %888 = vsyncpa [#allocation3], 1 }
 0x6e3   :  { %890 = vsyncpa [#allocation3 + $0x1], 1 }
 0x6e4   :  { %891 = vsyncpa [#allocation7], 1 }
 0x6e5   :  { %892 = vsyncpa [#allocation4], 1 }
 0x6e6   :  { %894 = vsyncpa [#allocation4 + $0x1], 1 }
 0x6e7   :  { %895 = vsyncpa [#allocation5], 1 }
 0x6e8   :  { %897 = vsyncpa [#allocation5 + $0x1], 1 }

</bundles_post_ra>
